<compile_context>
chip_gen: v5e
topology: v5e:2x2
jax: 0.10.0
libtpu: 0.0.40
codegen_flags: <defaults>
</compile_context>

<pallas_src>
import functools

import jax
import jax.numpy as jnp
from jax import lax
from jax.experimental import pallas as pl
from jax.experimental.pallas import tpu as pltpu

F32 = jnp.float32
BF16 = jnp.bfloat16
VMEM_LIMIT = 32 * 1024 * 1024


def _cparams(dims):
    return pltpu.CompilerParams(dimension_semantics=dims,
                                vmem_limit_bytes=VMEM_LIMIT)


# ----------------------------- Pallas kernels -----------------------------

def _normalize_kernel(x_ref, mean_ref, invstd_ref, o_ref):
    # frames = ((x + 1) / 2 - mean) / std   (per channel), all frames at once
    x = (x_ref[...] + 1.0) * 0.5
    o_ref[...] = (x - mean_ref[...]) * invstd_ref[...]


def _fused_attention_kernel(p1_ref, p2_ref, o_ref, *, temp):
    # Per batch: affinity -> softmax(dim=1, *temp) -> softmax(transpose, dim=1)
    #            -> attention bmm.  Everything stays in VMEM/vregs.
    p1 = p1_ref[0]                                    # (C, P) bf16
    p2 = p2_ref[0]                                    # (C, P) bf16
    a = lax.dot_general(p1, p2, (((0,), (0,)), ((), ())),
                        preferred_element_type=F32)   # (P, P) = p1^T @ p2
    a = a * temp
    # sal_mat = softmax over dim=1 of (B, P, P)  ==  axis 0 of (P, P)
    m0 = jnp.max(a, axis=0, keepdims=True)
    e0 = jnp.exp(a - m0)
    s = e0 / jnp.sum(e0, axis=0, keepdims=True)
    # sal_mat_T = softmax(transpose(sal_mat), dim=1)
    #           = transpose(softmax(sal_mat, axis=-1))  -> lane softmax, no
    #             HBM-materialized transpose (temp applies only to the first).
    m1 = jnp.max(s, axis=1, keepdims=True)
    e1 = jnp.exp(s - m1)
    v = e1 / jnp.sum(e1, axis=1, keepdims=True)       # v[i, j] = sal_mat_T[j, i]
    # att[c, i] = sum_j p2[c, j] * sal_mat_T[j, i] = sum_j p2[c, j] * v[i, j]
    att = lax.dot_general(p2, v.astype(p2.dtype), (((1,), (1,)), ((), ())),
                          preferred_element_type=F32)  # (C, P)
    o_ref[0] = att


def _aff_softmax_kernel(f1_ref, f2_ref, o_ref, *, temp):
    # affinity (f1^T @ f2) fused with softmax(dim=1, * temp)
    a = lax.dot_general(f1_ref[0], f2_ref[0], (((0,), (0,)), ((), ())),
                        preferred_element_type=F32)
    a = a * temp
    m = jnp.max(a, axis=0, keepdims=True)
    e = jnp.exp(a - m)
    o_ref[0] = e / jnp.sum(e, axis=0, keepdims=True)


def _gc1_kernel(pv_ref, ph_ref, wl_ref, bl_ref, wr_ref, br_ref, ol_ref, or_ref):
    # GC stage 1: conv_l1 (7,1) and conv_r1 (1,7) as im2col matmuls, batch
    # folded into N.  bf16 operands, f32 accumulation.
    ol_ref[...] = (jnp.dot(wl_ref[...], pv_ref[...],
                           preferred_element_type=F32) + bl_ref[...])
    or_ref[...] = (jnp.dot(wr_ref[...], ph_ref[...],
                           preferred_element_type=F32) + br_ref[...])


def _gc2_bn_relu_kernel(plh_ref, prv_ref, wl_ref, bl_ref, wr_ref, br_ref,
                        sc_ref, sh_ref, o_ref):
    # GC stage 2 (conv_l2 + conv_r2) + add + BatchNorm + ReLU.
    s = (jnp.dot(wl_ref[...], plh_ref[...], preferred_element_type=F32)
         + bl_ref[...]
         + jnp.dot(wr_ref[...], prv_ref[...], preferred_element_type=F32)
         + br_ref[...])
    o_ref[...] = jnp.maximum(s * sc_ref[...] + sh_ref[...], 0.0)


def _head_sigmoid_kernel(p_ref, w_ref, b_ref, o_ref):
    # three dilated Co=1 convs (stacked along K) + sum + numerically-stable
    # sigmoid, all in one matmul.
    s = jnp.dot(w_ref[...], p_ref[...], preferred_element_type=F32) + b_ref[...]
    e = jnp.exp(-jnp.abs(s))
    o_ref[...] = jnp.where(s >= 0.0, 1.0 / (1.0 + e), e / (1.0 + e))


# ------------------------------- glue helpers -------------------------------

def maxpool2(x):
    # nn.MaxPool2d(kernel_size=2)  (tiny reduction, kept as XLA glue)
    B, C, H, W = x.shape
    return x.reshape(B, C, H // 2, 2, W // 2, 2).max(axis=(3, 5))


def im2col(x, kh, kw, dilation=(1, 1), padding=(0, 0)):
    """(B, Ci, H, W) -> bf16 patches of shape (kh*kw*Ci, B*H*W).

    Column order is (b, h, w); row order is (tap_i, tap_j, ci), matching
    flatten_weight.  Batch is folded into the matmul N dimension.
    """
    B, Ci, H, W = x.shape
    dh, dw = dilation
    ph, pw = padding
    xp = jnp.pad(x, ((0, 0), (0, 0), (ph, ph), (pw, pw)))
    cols = []
    for i in range(kh):
        for j in range(kw):
            hs, ws = i * dh, j * dw
            cols.append(xp[:, :, hs:hs + H, ws:ws + W].reshape(B, Ci, H * W))
    pat = jnp.concatenate(cols, axis=1)                       # (B, K, P)
    K = kh * kw * Ci
    return jnp.transpose(pat, (1, 0, 2)).reshape(K, B * H * W).astype(BF16)


def flatten_weight(w):
    # (Co, Ci, kh, kw) -> bf16 (Co, kh*kw*Ci) in (tap_i, tap_j, ci) order.
    Co, Ci, kh, kw = w.shape
    return jnp.transpose(w, (0, 2, 3, 1)).reshape(Co, kh * kw * Ci).astype(BF16)


def cols_to_nchw(y, B, H, W):
    # (Co, B*H*W) -> (B, Co, H, W)
    Co = y.shape[0]
    return jnp.transpose(y.reshape(Co, B, H * W), (1, 0, 2)).reshape(B, Co, H, W)


# ------------------------------- wrappers ----------------------------------

def normalize_frames(frames_list, mean, inv_std):
    # All frames in one fused elementwise kernel (lane-dense H*W last dim).
    n = len(frames_list)
    B, C, H, W = frames_list[0].shape
    x = jnp.stack(frames_list, 0).reshape(n * B, C, H * W)
    out = pl.pallas_call(
        _normalize_kernel,
        out_shape=jax.ShapeDtypeStruct((n * B, C, H * W), F32),
        grid=(1,),
        in_specs=[pl.BlockSpec((n * B, C, H * W), lambda i: (0, 0, 0)),
                  pl.BlockSpec((1, C, 1), lambda i: (0, 0, 0)),
                  pl.BlockSpec((1, C, 1), lambda i: (0, 0, 0))],
        out_specs=pl.BlockSpec((n * B, C, H * W), lambda i: (0, 0, 0)),
        compiler_params=_cparams(("arbitrary",)),
    )(x, mean.reshape(1, C, 1), inv_std.reshape(1, C, 1))
    out = out.reshape(n, B, C, H, W)
    return [out[i] for i in range(n)]


def fused_attention(pool_1, pool_2, temp):
    B, C, h, w = pool_1.shape
    P = h * w
    p1 = pool_1.reshape(B, C, P).astype(BF16)
    p2 = pool_2.reshape(B, C, P).astype(BF16)
    att = pl.pallas_call(
        functools.partial(_fused_attention_kernel, temp=float(temp)),
        out_shape=jax.ShapeDtypeStruct((B, C, P), F32),
        grid=(B,),
        in_specs=[pl.BlockSpec((1, C, P), lambda i: (i, 0, 0)),
                  pl.BlockSpec((1, C, P), lambda i: (i, 0, 0))],
        out_specs=pl.BlockSpec((1, C, P), lambda i: (i, 0, 0)),
        compiler_params=_cparams(("parallel",)),
    )(p1, p2)
    return att.reshape(B, C, h, w)


def affinity_softmax(f1, f2, temp):
    B, C, H, W = f1.shape
    M = H * W
    a = f1.reshape(B, C, M).astype(BF16)
    b = f2.reshape(B, C, M).astype(BF16)
    return pl.pallas_call(
        functools.partial(_aff_softmax_kernel, temp=float(temp)),
        out_shape=jax.ShapeDtypeStruct((B, M, M), F32),
        grid=(B,),
        in_specs=[pl.BlockSpec((1, C, M), lambda i: (i, 0, 0)),
                  pl.BlockSpec((1, C, M), lambda i: (i, 0, 0))],
        out_specs=pl.BlockSpec((1, M, M), lambda i: (i, 0, 0)),
        compiler_params=_cparams(("parallel",)),
    )(a, b)


def gc_stage1(x, wl1, bl1, wr1, br1):
    # conv_l1 = (7,1) pad (3,0); conv_r1 = (1,7) pad (0,3); both in one kernel.
    B, Ci, H, W = x.shape
    pv = im2col(x, 7, 1, padding=(3, 0))          # (7*Ci, B*P)
    ph = im2col(x, 1, 7, padding=(0, 3))          # (7*Ci, B*P)
    N = B * H * W
    Co = wl1.shape[0]
    xl, xr = pl.pallas_call(
        _gc1_kernel,
        out_shape=(jax.ShapeDtypeStruct((Co, N), F32),
                   jax.ShapeDtypeStruct((Co, N), F32)),
        grid=(1,),
        in_specs=[pl.BlockSpec(pv.shape, lambda i: (0, 0)),
                  pl.BlockSpec(ph.shape, lambda i: (0, 0)),
                  pl.BlockSpec(wl1.shape, lambda i: (0, 0)),
                  pl.BlockSpec((Co, 1), lambda i: (0, 0)),
                  pl.BlockSpec(wr1.shape, lambda i: (0, 0)),
                  pl.BlockSpec((Co, 1), lambda i: (0, 0))],
        out_specs=[pl.BlockSpec((Co, N), lambda i: (0, 0)),
                   pl.BlockSpec((Co, N), lambda i: (0, 0))],
        compiler_params=_cparams(("arbitrary",)),
    )(pv, ph, wl1, bl1, wr1, br1)
    return cols_to_nchw(xl, B, H, W), cols_to_nchw(xr, B, H, W)


def gc_stage2_bn_relu(xl1, xr1, wl2, bl2, wr2, br2, bn_scale, bn_shift):
    # conv_l2 = (1,7) pad (0,3); conv_r2 = (7,1) pad (3,0); add + BN + ReLU.
    B, Cm, H, W = xl1.shape
    plh = im2col(xl1, 1, 7, padding=(0, 3))       # (7*Cm, B*P)
    prv = im2col(xr1, 7, 1, padding=(3, 0))       # (7*Cm, B*P)
    N = B * H * W
    Co = wl2.shape[0]
    y = pl.pallas_call(
        _gc2_bn_relu_kernel,
        out_shape=jax.ShapeDtypeStruct((Co, N), F32),
        grid=(1,),
        in_specs=[pl.BlockSpec(plh.shape, lambda i: (0, 0)),
                  pl.BlockSpec(prv.shape, lambda i: (0, 0)),
                  pl.BlockSpec(wl2.shape, lambda i: (0, 0)),
                  pl.BlockSpec((Co, 1), lambda i: (0, 0)),
                  pl.BlockSpec(wr2.shape, lambda i: (0, 0)),
                  pl.BlockSpec((Co, 1), lambda i: (0, 0)),
                  pl.BlockSpec((Co, 1), lambda i: (0, 0)),
                  pl.BlockSpec((Co, 1), lambda i: (0, 0))],
        out_specs=pl.BlockSpec((Co, N), lambda i: (0, 0)),
        compiler_params=_cparams(("arbitrary",)),
    )(plh, prv, wl2, bl2, wr2, br2, bn_scale, bn_shift)
    return cols_to_nchw(y, B, H, W)


def dilated_head_sigmoid(x, w_head, b_head):
    # weak_conv2_{1,2,3} (3x3, dilation 6/12/18, Co=1) + sum + sigmoid fused.
    B, Cm, H, W = x.shape
    pats = [im2col(x, 3, 3, dilation=(d, d), padding=(d, d)) for d in (6, 12, 18)]
    pat = jnp.concatenate(pats, axis=0)           # (3*9*Cm, B*P)
    N = B * H * W
    y = pl.pallas_call(
        _head_sigmoid_kernel,
        out_shape=jax.ShapeDtypeStruct((1, N), F32),
        grid=(1,),
        in_specs=[pl.BlockSpec(pat.shape, lambda i: (0, 0)),
                  pl.BlockSpec(w_head.shape, lambda i: (0, 0)),
                  pl.BlockSpec((1, 1), lambda i: (0, 0))],
        out_specs=pl.BlockSpec((1, N), lambda i: (0, 0)),
        compiler_params=_cparams(("arbitrary",)),
    )(pat, w_head, b_head)
    return cols_to_nchw(y, B, H, W)


# --------------------------- parameter creation -----------------------------

VALUE_NUM = 256          # self.value_num
GC_IN = 512 * 2          # weak_conv1 inplanes
GC_MID = 256             # GC hidden width
FEAT_C = 512             # gray-encoder feature channels (self.channel)


def init_params(key):
    ks = jax.random.split(key, 16)

    def u(k, shape, fan_in):
        bound = 1.0 / (fan_in ** 0.5)
        return jax.random.uniform(k, shape, F32, -bound, bound)

    p = {}
    # weak_conv1 = GC(1024, 256, kh=7, kw=7)
    p['gc_l1_w'] = u(ks[0], (GC_MID, GC_IN, 7, 1), GC_IN * 7)
    p['gc_l1_b'] = u(ks[1], (GC_MID,), GC_IN * 7)
    p['gc_l2_w'] = u(ks[2], (VALUE_NUM, GC_MID, 1, 7), GC_MID * 7)
    p['gc_l2_b'] = u(ks[3], (VALUE_NUM,), GC_MID * 7)
    p['gc_r1_w'] = u(ks[4], (GC_MID, GC_IN, 1, 7), GC_IN * 7)
    p['gc_r1_b'] = u(ks[5], (GC_MID,), GC_IN * 7)
    p['gc_r2_w'] = u(ks[6], (VALUE_NUM, GC_MID, 7, 1), GC_MID * 7)
    p['gc_r2_b'] = u(ks[7], (VALUE_NUM,), GC_MID * 7)
    # weak_bn = BatchNorm2d(256)
    p['bn_gamma'] = jnp.ones((VALUE_NUM,), F32)
    p['bn_beta'] = jnp.zeros((VALUE_NUM,), F32)
    p['bn_mean'] = jnp.zeros((VALUE_NUM,), F32)
    p['bn_var'] = jnp.ones((VALUE_NUM,), F32)
    # weak_conv2_{1,2,3} = Conv2d(256, 1, 3, dilation={6,12,18}, padding={6,12,18})
    p['c21_w'] = u(ks[8], (1, VALUE_NUM, 3, 3), VALUE_NUM * 9)
    p['c21_b'] = u(ks[9], (1,), VALUE_NUM * 9)
    p['c22_w'] = u(ks[10], (1, VALUE_NUM, 3, 3), VALUE_NUM * 9)
    p['c22_b'] = u(ks[11], (1,), VALUE_NUM * 9)
    p['c23_w'] = u(ks[12], (1, VALUE_NUM, 3, 3), VALUE_NUM * 9)
    p['c23_b'] = u(ks[13], (1,), VALUE_NUM * 9)
    # normalize(mean, std)
    p['mean'] = jnp.array([0.485, 0.456, 0.406], F32)
    p['std'] = jnp.array([0.229, 0.224, 0.225], F32)
    return p


def prepare_params(p, eps=1e-5):
    """One-time inference-time weight prep: flatten + bf16-cast conv weights,
    fold BN into scale/shift, stack the three dilated-head weights."""
    q = {}
    q['wl1'] = flatten_weight(p['gc_l1_w'])
    q['bl1'] = p['gc_l1_b'].reshape(-1, 1)
    q['wl2'] = flatten_weight(p['gc_l2_w'])
    q['bl2'] = p['gc_l2_b'].reshape(-1, 1)
    q['wr1'] = flatten_weight(p['gc_r1_w'])
    q['br1'] = p['gc_r1_b'].reshape(-1, 1)
    q['wr2'] = flatten_weight(p['gc_r2_w'])
    q['br2'] = p['gc_r2_b'].reshape(-1, 1)
    # NOTE: BatchNorm2d evaluated in inference mode using running statistics.
    scale = p['bn_gamma'] / jnp.sqrt(p['bn_var'] + eps)
    q['bn_scale'] = scale.reshape(-1, 1)
    q['bn_shift'] = (p['bn_beta'] - p['bn_mean'] * scale).reshape(-1, 1)
    q['w_head'] = jnp.concatenate(
        [flatten_weight(p['c21_w']), flatten_weight(p['c22_w']),
         flatten_weight(p['c23_w'])], axis=1)               # (1, 3*9*256)
    q['b_head'] = (p['c21_b'] + p['c22_b'] + p['c23_b']).reshape(1, 1)
    q['mean'] = p['mean']
    q['inv_std'] = 1.0 / p['std']
    return q


# ------------------------------ forward pass --------------------------------

def forward(prep, gray1, gray1_org, gray1_sal, gray2, segments, temp,
            Fgray1, Fgray1_org, Fgray2):
    # input preprocessing: ((x+1)/2 - mean)/std  (one fused Pallas kernel)
    gray1_n, gray2_n, gray1_org_n = normalize_frames(
        [gray1, gray2, gray1_org], prep['mean'], prep['inv_std'])
    # TODO(synk): encoder_res18 / encoder3 / decoder3 / DeepLab_org are external
    # pretrained modules not defined in the reference source; the encoded
    # features (Fgray1, Fgray1_org, Fgray2) are therefore taken as inputs.
    _ = (gray1_n, gray2_n, gray1_org_n, gray1_sal)

    B, N, C, H, W = segments.shape  # only .size() is used, as in the reference

    pool_1 = maxpool2(Fgray1_org)
    pool_2 = maxpool2(Fgray2)

    # fused: affinity -> softmax(dim=1,*temp) -> softmax(transposed,dim=1) -> bmm
    att = fused_attention(pool_1, pool_2, temp)               # (B, 512, h, w)

    input1_att = jnp.concatenate([pool_1, att], axis=1)       # (B, 1024, h, w)

    # weak_conv1 (GC) + weak_bn + ReLU: two fused kernels
    xl1, xr1 = gc_stage1(input1_att, prep['wl1'], prep['bl1'],
                         prep['wr1'], prep['br1'])
    sal_bn = gc_stage2_bn_relu(xl1, xr1, prep['wl2'], prep['bl2'],
                               prep['wr2'], prep['br2'],
                               prep['bn_scale'], prep['bn_shift'])

    # weak_conv2_{1,2,3} + sum + sigmoid: one fused kernel
    saliency_map1s = dilated_head_sigmoid(sal_bn, prep['w_head'], prep['b_head'])

    # aff = nlm(Fgray1, Fgray2); aff_norm = softmax(aff * temp, dim=1)  (fused)
    aff_norm = affinity_softmax(Fgray1, Fgray2, temp)

    # color1 is None -> reference returns (aff_norm, Fgray1, Fgray2); the
    # saliency branch is still computed (as in the reference) and returned so
    # it can be materialized/checked.
    return aff_norm, Fgray1, Fgray2, saliency_map1s


# ---------------------------------- main -------------------------------------

if __name__ == "__main__":
    key = jax.random.PRNGKey(0)
    pkey, dkey = jax.random.split(key)
    params = init_params(pkey)
    prep = prepare_params(params)
    ks = jax.random.split(dkey, 8)

    B = 2
    Hi = Wi = 32          # raw gray frame size
    Hf = Wf = 8           # gray-encoder feature spatial size (channels = 512)

    gray1 = jax.random.uniform(ks[0], (B, 3, Hi, Wi), F32, -1.0, 1.0)
    gray1_org = jax.random.uniform(ks[1], (B, 3, Hi, Wi), F32, -1.0, 1.0)
    gray2 = jax.random.uniform(ks[2], (B, 3, Hi, Wi), F32, -1.0, 1.0)
    gray1_sal = jax.random.uniform(ks[3], (B, 1, Hi, Wi), F32, 0.0, 1.0)
    segments = jax.random.uniform(ks[4], (B, 3, 1, Hi, Wi), F32)
    Fgray1 = jax.random.normal(ks[5], (B, FEAT_C, Hf, Wf), F32)
    Fgray1_org = jax.random.normal(ks[6], (B, FEAT_C, Hf, Wf), F32)
    Fgray2 = jax.random.normal(ks[7], (B, FEAT_C, Hf, Wf), F32)

    outs = forward(prep, gray1, gray1_org, gray1_sal, gray2, segments,
                   temp=1.0, Fgray1=Fgray1, Fgray1_org=Fgray1_org, Fgray2=Fgray2)
    outs = jax.tree_util.tree_map(jax.block_until_ready, outs)
    print("KERNEL_OK")
</pallas_src>

<mosaic_0001>
module attributes {stable_mosaic.version = 11 : i64} {
  func.func @_normalize_kernel(%arg0: i32, %arg1: memref<6x3x1024xf32, #tpu.memory_space<vmem>>, %arg2: memref<1x3x1xf32, #tpu.memory_space<vmem>>, %arg3: memref<1x3x1xf32, #tpu.memory_space<vmem>>, %arg4: memref<6x3x1024xf32, #tpu.memory_space<vmem>>) attributes {dimension_semantics = [#tpu.dimension_semantics<arbitrary>], iteration_bounds = array<i64: 1>, scalar_prefetch = 0 : i64, scratch_operands = 0 : i64, tpu.core_type = #tpu.core_type<tc>, window_params = [{pipeline_mode = #tpu.pipeline_mode<synchronous>, transform_indices = @transform_0, window_bounds = array<i64: 6, 3, 1024>}, {pipeline_mode = #tpu.pipeline_mode<synchronous>, transform_indices = @transform_1, window_bounds = array<i64: 1, 3, 1>}, {pipeline_mode = #tpu.pipeline_mode<synchronous>, transform_indices = @transform_2, window_bounds = array<i64: 1, 3, 1>}, {pipeline_mode = #tpu.pipeline_mode<synchronous>, transform_indices = @transform_3, window_bounds = array<i64: 6, 3, 1024>}]} {
    %c0 = arith.constant 0 : index
    %c0_0 = arith.constant 0 : index
    %c0_1 = arith.constant 0 : index
    %0 = vector.load %arg1[%c0, %c0_0, %c0_1] : memref<6x3x1024xf32, #tpu.memory_space<vmem>>, vector<6x3x1024xf32>
    %cst = arith.constant 1.000000e+00 : f32
    %1 = vector.broadcast %cst : f32 to vector<6x3x1024xf32>
    %2 = arith.addf %0, %1 : vector<6x3x1024xf32>
    %cst_2 = arith.constant 5.000000e-01 : f32
    %3 = vector.broadcast %cst_2 : f32 to vector<6x3x1024xf32>
    %4 = arith.mulf %2, %3 : vector<6x3x1024xf32>
    %c0_3 = arith.constant 0 : index
    %c0_4 = arith.constant 0 : index
    %c0_5 = arith.constant 0 : index
    %5 = vector.load %arg2[%c0_3, %c0_4, %c0_5] : memref<1x3x1xf32, #tpu.memory_space<vmem>>, vector<1x3x1xf32>
    %6 = vector.broadcast %5 : vector<1x3x1xf32> to vector<6x3x1024xf32>
    %7 = arith.subf %4, %6 : vector<6x3x1024xf32>
    %c0_6 = arith.constant 0 : index
    %c0_7 = arith.constant 0 : index
    %c0_8 = arith.constant 0 : index
    %8 = vector.load %arg3[%c0_6, %c0_7, %c0_8] : memref<1x3x1xf32, #tpu.memory_space<vmem>>, vector<1x3x1xf32>
    %9 = vector.broadcast %8 : vector<1x3x1xf32> to vector<6x3x1024xf32>
    %10 = arith.mulf %7, %9 : vector<6x3x1024xf32>
    %c0_9 = arith.constant 0 : index
    %c0_10 = arith.constant 0 : index
    %c0_11 = arith.constant 0 : index
    %11 = vector.load %arg4[%c0_9, %c0_10, %c0_11] : memref<6x3x1024xf32, #tpu.memory_space<vmem>>, vector<6x3x1024xf32>
    tpu.vector_store %arg4[%c0_9, %c0_10, %c0_11], %10 {strides = array<i32>} : memref<6x3x1024xf32, #tpu.memory_space<vmem>>, vector<6x3x1024xf32>,
    return
  }
  func.func @transform_0(%arg0: i32) -> (i32, i32, i32) {
    %c0_i32 = arith.constant 0 : i32
    %c0_i32_0 = arith.constant 0 : i32
    %c0_i32_1 = arith.constant 0 : i32
    %c0_i32_2 = arith.constant 0 : i32
    return %c0_i32, %c0_i32_0, %c0_i32_1 : i32, i32, i32
  }
  func.func @transform_1(%arg0: i32) -> (i32, i32, i32) {
    %c0_i32 = arith.constant 0 : i32
    %c0_i32_0 = arith.constant 0 : i32
    %c0_i32_1 = arith.constant 0 : i32
    %c0_i32_2 = arith.constant 0 : i32
    return %c0_i32, %c0_i32_0, %c0_i32_1 : i32, i32, i32
  }
  func.func @transform_2(%arg0: i32) -> (i32, i32, i32) {
    %c0_i32 = arith.constant 0 : i32
    %c0_i32_0 = arith.constant 0 : i32
    %c0_i32_1 = arith.constant 0 : i32
    %c0_i32_2 = arith.constant 0 : i32
    return %c0_i32, %c0_i32_0, %c0_i32_1 : i32, i32, i32
  }
  func.func @transform_3(%arg0: i32) -> (i32, i32, i32) {
    %c0_i32 = arith.constant 0 : i32
    %c0_i32_0 = arith.constant 0 : i32
    %c0_i32_1 = arith.constant 0 : i32
    %c0_i32_2 = arith.constant 0 : i32
    return %c0_i32, %c0_i32_0, %c0_i32_1 : i32, i32, i32
  }
}

</mosaic_0001>

<bundles_post_ra>
// kernel: tpu_custom_call.1
= control target key start
LH: loop header
LB: loop body
LE: loop exit
PB: predicated region body
PF: predicated region fallthrough
CT: control target
= control target key end

     0   :  { %8 = vsyncpa [#allocation3], 0  ;;  %s369_s0 = inlined_call_operand.hbm [shape: f32[6,3,1024], index: 0, kind: input, shape index: {}]   ;;  %s370_s1 = inlined_call_operand.vmem [shape: f32[1,3,1], index: 1, kind: input, shape index: {}]   ;;  %s371_s2 = inlined_call_operand.vmem [shape: f32[1,3,1], index: 2, kind: input, shape index: {}]   ;;  %s372_s3 = inlined_call_operand.hbm [shape: f32[6,3,1024], index: 3, kind: output, shape index: {}]  }
   0x1   :  { %9 = vsyncpa [#allocation4], 0  ;;  %s14_s14 = sshll.u32 %s369_s0, 4  ;;  %s273_s15 = smov [#allocation2]   ;;  %s15_s14 = int_to_ptr.hbm [resolvable:$true] %s14_s14 }
   0x2   :  { %s16_s16 = sshll.u32 %s273_s15, 4  ;;  %s274_s17 = smov 512   ;;  %s17_s16 = int_to_ptr.vmem [resolvable:$true] %s16_s16 }
   0x3   :  { %s275_s18 = smov 32  }
   0x4   :  { %22 = dma.hbm_to_vmem [thread:$0]  %s15_s14, 3072, %s17_s16, [#allocation3], %s274_s17, %s274_s17, %s275_s18  }
   0x5   :  { %269 = dma.done.wait [#allocation3], 3072  }
   0x6   :  { %270 = vsyncadd [#allocation3], 4294964224  ;;  %v276_v0 = vmov 0   ;;  %v103_v1 = vld [vmem:[%s370_s1] sm:$0x7]  ;;  %s278_s1 = smov [#allocation5]  }
   0x7   :  { %220 = vset.pattern.permute.xlu0 %v276_v0  ;;  %v137_v2 = vld [vmem:[%s371_s2] sm:$0x7]  ;;  %v277_v3 = vmov 839922192   ;;  %v32_v6 = vld [vmem:[#allocation2 + $0x8] sm:$0x77] }
   0x8   :  { %106 = vperm.xlu0 %220, %v103_v1   ;;  %v109_v4 = vunpack.c.l.s4 %v277_v3  ;;  %v31_v5 = vld [vmem:[#allocation2] sm:$0x77]  ;;  %v33_v7 = vld [vmem:[#allocation2 + $0x10] sm:$0x77]  ;;  %v34_v8 = vld [vmem:[#allocation2 + $0x18] sm:$0x77] }
   0x9   :  { %v35_v10 = vld [vmem:[#allocation2 + $0x20] sm:$0x77]  ;;  %v36_v11 = vld [vmem:[#allocation2 + $0x28] sm:$0x77]  ;;  %v37_v13 = vld [vmem:[#allocation2 + $0x30] sm:$0x77] }
   0xa   :  { %v110_v12 = vunpack.c.0.s8 %v109_v4  ;;  %v55_v14 = vadd.f32 1.0, %v31_v5  ;;  %v56_v15 = vadd.f32 1.0, %v32_v6  ;;  %v57_v16 = vadd.f32 1.0, %v33_v7  ;;  %v38_v18 = vld [vmem:[#allocation2 + $0x38] sm:$0x77]  ;;  %s199_s2 = sshll.u32 %s278_s1, 4  ;;  %s200_s2 = int_to_ptr.vmem [resolvable:$true] %s199_s2 }
   0xb   :  { %v58_v17 = vadd.f32 1.0, %v34_v8  ;;  %v39_v19 = vld [vmem:[#allocation2 + $0x40] sm:$0x77]  ;;  %v59_v20 = vadd.f32 1.0, %v35_v10  ;;  %v40_v21 = vld [vmem:[#allocation2 + $0x48] sm:$0x77] }
   0xc   :  { %v41_v22 = vld [vmem:[#allocation2 + $0x50] sm:$0x77]  ;;  %v60_v23 = vadd.f32 1.0, %v36_v11  ;;  %v61_v24 = vadd.f32 1.0, %v37_v13  ;;  %v42_v26 = vld [vmem:[#allocation2 + $0x58] sm:$0x77] }
   0xd   :  { %v79_v27 = vmul.f32 0.5, %v55_v14  ;;  %v80_v28 = vmul.f32 0.5, %v56_v15  ;;  %v81_v29 = vmul.f32 0.5, %v57_v16  ;;  %v62_v30 = vadd.f32 1.0, %v38_v18  ;;  %v43_v33 = vld [vmem:[#allocation2 + $0x60] sm:$0x77] }
   0xe   :  { %v63_v31 = vadd.f32 1.0, %v39_v19  ;;  %v82_v32 = vmul.f32 0.5, %v58_v17  ;;  %v64_v34 = vadd.f32 1.0, %v40_v21  ;;  %v83_v35 = vmul.f32 0.5, %v59_v20  ;;  %v44_v42 = vld [vmem:[#allocation2 + $0x68] sm:$0x77] }
   0xf   :  { %v65_v37 = vadd.f32 1.0, %v41_v22  ;;  %v66_v38 = vadd.f32 1.0, %v42_v26  ;;  %v84_v39 = vmul.f32 0.5, %v60_v23  ;;  %v85_v40 = vmul.f32 0.5, %v61_v24  ;;  %v45_v46 = vld [vmem:[#allocation2 + $0x70] sm:$0x77] }
  0x10   :  { %140 = vperm.xlu0 %220, %v137_v2   ;;  %v67_v47 = vadd.f32 1.0, %v43_v33  ;;  %v86_v48 = vmul.f32 0.5, %v62_v30  ;;  %v87_v49 = vmul.f32 0.5, %v63_v31  ;;  %v46_v51 = vld [vmem:[#allocation2 + $0x78] sm:$0x77]  ;;  %v68_v57 = vadd.f32 1.0, %v44_v42 }
  0x11   :  { %v47_v56 = vld [vmem:[#allocation2 + $0x80] sm:$0x77]  ;;  %v88_v58 = vmul.f32 0.5, %v64_v34  ;;  %v48_v61 = vld [vmem:[#allocation2 + $0x88] sm:$0x77]  ;;  %v69_v62 = vadd.f32 1.0, %v45_v46 }
  0x12   :  { %v89_v63 = vmul.f32 0.5, %v65_v37  ;;  %v49_v2 = vld [vmem:[#allocation2 + $0x90] sm:$0x77]  ;;  %v70_v3 = vadd.f32 1.0, %v46_v51  ;;  %v90_v4 = vmul.f32 0.5, %v66_v38  ;;  %v71_v8 = vadd.f32 1.0, %v47_v56 }
  0x13   :  { %v50_v7 = vld [vmem:[#allocation2 + $0x98] sm:$0x77]  ;;  %v72_v13 = vadd.f32 1.0, %v48_v61  ;;  %v92_v14 = vmul.f32 0.5, %v68_v57  ;;  %v52_v17 = vld [vmem:[#allocation2 + $0xa8] sm:$0x77] }
  0x14   :  { %v73_v18 = vadd.f32 1.0, %v49_v2  ;;  %v93_v19 = vmul.f32 0.5, %v69_v62  ;;  %v53_v22 = vld [vmem:[#allocation2 + $0xb0] sm:$0x77]  ;;  %v74_v23 = vadd.f32 1.0, %v50_v7  ;;  %v94_v24 = vmul.f32 0.5, %v70_v3 }
  0x15   :  { %v95_v30 = vmul.f32 0.5, %v71_v8  ;;  %v76_v33 = vadd.f32 1.0, %v52_v17  ;;  %v96_v34 = vmul.f32 0.5, %v72_v13  ;;  %v77_v37 = vadd.f32 1.0, %v53_v22  ;;  %s201_s24 = sshll.u32 %s372_s3, 4  ;;  %s202_s24 = int_to_ptr.hbm [resolvable:$true] %s201_s24 }
  0x16   :  { %v97_v38 = vmul.f32 0.5, %v73_v18 }
  0x7a   :  { %v107_v9 = vpop.permute.xlu0 %106 }
  0x7b   :  { %v311_v25 = vperm.slane %v107_v9, %v110_v12  ;;  %v91_v9 = vmul.f32 0.5, %v67_v47 }
  0x7d   :  { %v113_v43 = vsub.f32 %v79_v27, %v311_v25  ;;  %v114_v44 = vsub.f32 %v80_v28, %v311_v25  ;;  %v115_v45 = vsub.f32 %v81_v29, %v311_v25  ;;  %v116_v50 = vsub.f32 %v82_v32, %v311_v25  ;;  %v54_v28 = vld [vmem:[#allocation2 + $0xb8] sm:$0x77] }
  0x7e   :  { %v117_v52 = vsub.f32 %v83_v35, %v311_v25  ;;  %v118_v59 = vsub.f32 %v84_v39, %v311_v25  ;;  %v119_v0 = vsub.f32 %v85_v40, %v311_v25  ;;  %v120_v5 = vsub.f32 %v86_v48, %v311_v25 }
  0x7f   :  { %v121_v10 = vsub.f32 %v87_v49, %v311_v25  ;;  %v122_v15 = vsub.f32 %v88_v58, %v311_v25  ;;  %v123_v20 = vsub.f32 %v89_v63, %v311_v25  ;;  %v124_v26 = vsub.f32 %v90_v4, %v311_v25 }
  0x80   :  { %v125_v31 = vsub.f32 %v91_v9, %v311_v25  ;;  %v126_v35 = vsub.f32 %v92_v14, %v311_v25  ;;  %v127_v39 = vsub.f32 %v93_v19, %v311_v25  ;;  %v78_v42 = vadd.f32 1.0, %v54_v28 }
  0x81   :  { %v129_v47 = vsub.f32 %v95_v30, %v311_v25  ;;  %v100_v49 = vmul.f32 0.5, %v76_v33 }
  0x82   :  { %v141_v36 = vpop.permute.xlu0 %140 }
  0x83   :  { %v313_v41 = vperm.slane %v141_v36, %v110_v12  ;;  %v51_v12 = vld [vmem:[#allocation2 + $0xa0] sm:$0x77] }
  0x84   :  { %v75_v29 = vadd.f32 1.0, %v51_v12 }
  0x85   :  { %v147_v53 = vmul.f32 %v313_v41, %v113_v43  ;;  %v148_v54 = vmul.f32 %v313_v41, %v114_v44  ;;  %v149_v55 = vmul.f32 %v313_v41, %v115_v45  ;;  %v150_v60 = vmul.f32 %v313_v41, %v116_v50 }
  0x86   :  { %v151_v1 = vmul.f32 %v313_v41, %v117_v52  ;;  %v152_v6 = vmul.f32 %v313_v41, %v118_v59  ;;  %v153_v11 = vmul.f32 %v313_v41, %v119_v0  ;;  %v154_v16 = vmul.f32 %v313_v41, %v120_v5 }
  0x87   :  { %171 = vst [vmem:[#allocation5] sm:$0x77] %v147_v53  ;;  %v155_v21 = vmul.f32 %v313_v41, %v121_v10  ;;  %v156_v27 = vmul.f32 %v313_v41, %v122_v15  ;;  %v157_v32 = vmul.f32 %v313_v41, %v123_v20  ;;  %v158_v36 = vmul.f32 %v313_v41, %v124_v26 }
  0x88   :  { %172 = vst [vmem:[#allocation5 + $0x8] sm:$0x77] %v148_v54  ;;  %v159_v40 = vmul.f32 %v313_v41, %v125_v31  ;;  %v98_v43 = vmul.f32 0.5, %v74_v23  ;;  %v128_v44 = vsub.f32 %v94_v24, %v311_v25  ;;  %v160_v45 = vmul.f32 %v313_v41, %v126_v35 }
  0x89   :  { %173 = vst [vmem:[#allocation5 + $0x10] sm:$0x77] %v149_v55  ;;  %v99_v46 = vmul.f32 0.5, %v75_v29  ;;  %v161_v48 = vmul.f32 %v313_v41, %v127_v39  ;;  %v130_v50 = vsub.f32 %v96_v34, %v311_v25  ;;  %v101_v52 = vmul.f32 0.5, %v77_v37 }
  0x8a   :  { %174 = vst [vmem:[#allocation5 + $0x18] sm:$0x77] %v150_v60  ;;  %v162_v51 = vmul.f32 %v313_v41, %v128_v44  ;;  %v131_v53 = vsub.f32 %v97_v38, %v311_v25  ;;  %v163_v54 = vmul.f32 %v313_v41, %v129_v47  ;;  %v102_v55 = vmul.f32 0.5, %v78_v42 }
  0x8b   :  { %175 = vst [vmem:[#allocation5 + $0x20] sm:$0x77] %v151_v1  ;;  %v132_v56 = vsub.f32 %v98_v43, %v311_v25  ;;  %v164_v57 = vmul.f32 %v313_v41, %v130_v50  ;;  %v133_v58 = vsub.f32 %v99_v46, %v311_v25  ;;  %v134_v60 = vsub.f32 %v100_v49, %v311_v25 }
  0x8c   :  { %176 = vst [vmem:[#allocation5 + $0x28] sm:$0x77] %v152_v6  ;;  %v165_v59 = vmul.f32 %v313_v41, %v131_v53  ;;  %v135_v62 = vsub.f32 %v101_v52, %v311_v25  ;;  %v136_v0 = vsub.f32 %v102_v55, %v311_v25 }
  0x8d   :  { %177 = vst [vmem:[#allocation5 + $0x30] sm:$0x77] %v153_v11  ;;  %v166_v61 = vmul.f32 %v313_v41, %v132_v56  ;;  %v167_v63 = vmul.f32 %v313_v41, %v133_v58  ;;  %v168_v1 = vmul.f32 %v313_v41, %v134_v60 }
  0x8e   :  { %178 = vst [vmem:[#allocation5 + $0x38] sm:$0x77] %v154_v16  ;;  %v169_v2 = vmul.f32 %v313_v41, %v135_v62  ;;  %v170_v3 = vmul.f32 %v313_v41, %v136_v0 }
  0x8f   :  { %179 = vst [vmem:[#allocation5 + $0x40] sm:$0x77] %v155_v21 }
  0x90   :  { %180 = vst [vmem:[#allocation5 + $0x48] sm:$0x77] %v156_v27 }
  0x91   :  { %181 = vst [vmem:[#allocation5 + $0x50] sm:$0x77] %v157_v32 }
  0x92   :  { %182 = vst [vmem:[#allocation5 + $0x58] sm:$0x77] %v158_v36 }
  0x93   :  { %183 = vst [vmem:[#allocation5 + $0x60] sm:$0x77] %v159_v40 }
  0x94   :  { %184 = vst [vmem:[#allocation5 + $0x68] sm:$0x77] %v160_v45 }
  0x95   :  { %185 = vst [vmem:[#allocation5 + $0x70] sm:$0x77] %v161_v48 }
  0x96   :  { %186 = vst [vmem:[#allocation5 + $0x78] sm:$0x77] %v162_v51 }
  0x97   :  { %187 = vst [vmem:[#allocation5 + $0x80] sm:$0x77] %v163_v54 }
  0x98   :  { %188 = vst [vmem:[#allocation5 + $0x88] sm:$0x77] %v164_v57 }
  0x99   :  { %189 = vst [vmem:[#allocation5 + $0x90] sm:$0x77] %v165_v59 }
  0x9a   :  { %190 = vst [vmem:[#allocation5 + $0x98] sm:$0x77] %v166_v61 }
  0x9b   :  { %191 = vst [vmem:[#allocation5 + $0xa0] sm:$0x77] %v167_v63 }
  0x9c   :  { %192 = vst [vmem:[#allocation5 + $0xa8] sm:$0x77] %v168_v1 }
  0x9d   :  { %193 = vst [vmem:[#allocation5 + $0xb0] sm:$0x77] %v169_v2 }
  0x9e   :  { %194 = vst [vmem:[#allocation5 + $0xb8] sm:$0x77] %v170_v3 }
  0x9f   :  { %207 = dma.vmem_to_hbm [thread:$0]  %s200_s2, 3072, %s202_s24, [#allocation4], %s274_s17, %s274_s17, %s275_s18  }
  0xa0   :  { %271 = dma.done.wait [#allocation4], 3072  }
  0xa1   :  { %272 = vsyncadd [#allocation4], 4294964224 }
  0xa2   :  { %212 = vsyncpa [#allocation3], 1 }
  0xa3   :  { %213 = vsyncpa [#allocation4], 1 }

</bundles_post_ra>
